<compile_context>
chip_gen: v7x
topology: tpu7x:2x2x1
jax: 0.10.0
libtpu: 0.0.40
codegen_flags: <defaults>
</compile_context>

<pallas_src>
import functools

import jax
import jax.numpy as jnp
from jax.experimental import pallas as pl
from jax.experimental.pallas import tpu as pltpu


def crossnet_v2_kernel(x_ref, w_ref, b_ref, out_ref, *, num_layers):
    """CrossNetV2 forward on one batch tile; all layer weights resident in VMEM.

    x_ref  : (TB, D)    f32  batch tile of X_0
    w_ref  : (L, D, D)  bf16 pre-transposed Linear weights (x @ w[l] == Linear_l(x))
    b_ref  : (L, 1, D)  f32  biases
    out_ref: (TB, D)    f32
    """
    x0 = x_ref[...]                      # f32 carry / epilogue operand
    xi = x0
    # Layers are sequentially dependent (cannot fuse across l); each step is one
    # lane-dense (TB, D) x (D, D) bf16 MXU matmul with f32 accumulation followed
    # by a small VPU epilogue in f32.
    for l in range(num_layers):
        xw = jnp.dot(xi.astype(jnp.bfloat16), w_ref[l],
                     preferred_element_type=jnp.float32) + b_ref[l]
        xi = xi + x0 * xw
    out_ref[...] = xi.astype(out_ref.dtype)


def crossnet_v2_forward(x, w, b, *, block_b=128):
    """x: (B, D) f32, w: (L, D, D) bf16 pre-transposed, b: (L, 1, D) f32 -> (B, D) f32."""
    B, D = x.shape
    L = w.shape[0]
    block_b = min(block_b, B)            # demo B=64 -> single grid step
    grid_len = pl.cdiv(B, block_b)

    # Explicit VMEM budget: x/out tiles double-buffered (f32) + single-buffered
    # resident weights (bf16) and biases (f32) + compiler/scratch headroom.
    vmem_bytes = (2 * 2 * block_b * D * 4            # x + out, 2 buffers each
                  + L * D * D * w.dtype.itemsize     # weights, Buffered(1)
                  + L * D * 4                        # biases,  Buffered(1)
                  + (8 << 20))                       # headroom
    vmem_bytes = int(min(vmem_bytes, 100 << 20))

    kernel = functools.partial(crossnet_v2_kernel, num_layers=L)

    return pl.pallas_call(
        kernel,
        out_shape=jax.ShapeDtypeStruct((B, D), jnp.float32),
        grid_spec=pltpu.PrefetchScalarGridSpec(
            num_scalar_prefetch=0,
            grid=(grid_len,),
            in_specs=[
                # Batch tile of X_0 (auto double-buffered across grid steps).
                pl.BlockSpec((block_b, D), lambda i: (i, 0)),
                # Weights: constant block index -> single-buffer residency.
                pl.BlockSpec((L, D, D), lambda i: (0, 0, 0),
                             pipeline_mode=pl.Buffered(1)),
                # Biases: same.
                pl.BlockSpec((L, 1, D), lambda i: (0, 0, 0),
                             pipeline_mode=pl.Buffered(1)),
            ],
            out_specs=pl.BlockSpec((block_b, D), lambda i: (i, 0)),
        ),
        compiler_params=pltpu.CompilerParams(
            dimension_semantics=("parallel",),       # megacore sharding on v7x
            vmem_limit_bytes=vmem_bytes,
        ),
    )(x, w, b)


def crossnet_v2_reference_matched(x, w, b):
    """Pure-JAX reference with the SAME numerics as the kernel (bf16 MXU operands,
    f32 accumulation and epilogue)."""
    x0 = x
    xi = x0
    for l in range(w.shape[0]):
        lin = jnp.dot(xi.astype(w.dtype), w[l],
                      preferred_element_type=jnp.float32) + b[l]
        xi = xi + x0 * lin
    return xi


def crossnet_v2_reference_f32(x, w, b):
    """Full-f32 reference matching the PyTorch forward semantics (for a loose
    end-to-end sanity check of the bf16-operand error growth over L layers)."""
    x0 = x
    xi = x0
    wf = w.astype(jnp.float32)
    for l in range(w.shape[0]):
        lin = jnp.dot(xi, wf[l], precision=jax.lax.Precision.HIGHEST) + b[l]
        xi = xi + x0 * lin
    return xi


def init_params(key, *, input_dim, num_layers):
    """Torch nn.Linear default init: U[-1/sqrt(fan_in), +1/sqrt(fan_in)].

    Weights are stored pre-transposed, shape (L, D_in, D_out), in bf16 (MXU
    operand dtype); biases stay f32 (added after the f32-accumulated dot).
    """
    kw, kb = jax.random.split(key)
    bound = 1.0 / (input_dim ** 0.5)
    w = jax.random.uniform(kw, (num_layers, input_dim, input_dim),
                           jnp.float32, -bound, bound).astype(jnp.bfloat16)
    b = jax.random.uniform(kb, (num_layers, 1, input_dim),
                           jnp.float32, -bound, bound)
    return w, b


if __name__ == "__main__":
    B, D, L = 64, 128, 3          # small, lane-dense (D multiple of 128)

    key = jax.random.PRNGKey(0)
    kx, kp = jax.random.split(key)
    x = jax.random.normal(kx, (B, D), dtype=jnp.float32)
    w, b = init_params(kp, input_dim=D, num_layers=L)

    out = crossnet_v2_forward(x, w, b, block_b=128)   # clamped to B -> grid=(1,)
    out = jax.block_until_ready(out)
    assert out.shape == (B, D)

    # Tight check against a reference with identical numerics (bf16 MXU, f32 acc).
    ref_matched = crossnet_v2_reference_matched(x, w, b)
    assert jnp.allclose(out, ref_matched, atol=1e-3, rtol=1e-3), \
        "mismatch vs matched-numerics reference"

    # Loose check against the full-f32 PyTorch-semantics reference (bf16 operand
    # rounding error over L=3 layers at D=128 stays well within a few percent).
    ref_f32 = crossnet_v2_reference_f32(x, w, b)
    assert jnp.allclose(out, ref_f32, atol=5e-2, rtol=5e-2), \
        "mismatch vs f32 reference (bf16 error growth too large)"

    print("KERNEL_OK")
</pallas_src>

<mosaic_0001>
module attributes {stable_mosaic.version = 11 : i64} {
  func.func @crossnet_v2_kernel(%arg0: i32, %arg1: memref<64x128xf32, #tpu.memory_space<vmem>>, %arg2: memref<3x128x128xbf16, #tpu.memory_space<vmem>>, %arg3: memref<3x1x128xf32, #tpu.memory_space<vmem>>, %arg4: memref<64x128xf32, #tpu.memory_space<vmem>>) attributes {dimension_semantics = [#tpu.dimension_semantics<parallel>], iteration_bounds = array<i64: 1>, scalar_prefetch = 0 : i64, scratch_operands = 0 : i64, tpu.core_type = #tpu.core_type<tc>, window_params = [{transform_indices = @transform_0, window_bounds = array<i64: 64, 128>}, {pipeline_mode = #tpu.pipeline_mode<synchronous>, transform_indices = @transform_1, window_bounds = array<i64: 3, 128, 128>}, {pipeline_mode = #tpu.pipeline_mode<synchronous>, transform_indices = @transform_2, window_bounds = array<i64: 3, 1, 128>}, {transform_indices = @transform_3, window_bounds = array<i64: 64, 128>}]} {
    %c0 = arith.constant 0 : index
    %c0_0 = arith.constant 0 : index
    %0 = vector.load %arg1[%c0, %c0_0] : memref<64x128xf32, #tpu.memory_space<vmem>>, vector<64x128xf32>
    %1 = arith.truncf %0 : vector<64x128xf32> to vector<64x128xbf16>
    %c0_1 = arith.constant 0 : index
    %c0_2 = arith.constant 0 : index
    %c0_3 = arith.constant 0 : index
    %2 = vector.load %arg2[%c0_1, %c0_2, %c0_3] : memref<3x128x128xbf16, #tpu.memory_space<vmem>>, vector<1x128x128xbf16>
    %3 = vector.shape_cast %2 : vector<1x128x128xbf16> to vector<128x128xbf16>
    %cst = arith.constant dense<0.000000e+00> : vector<64x128xf32>
    %4 = tpu.matmul %1, %3, %cst {dimension_numbers = #tpu.dot_dimension_numbers<[1], [0], [0], [1], [0, 0, 1, 1], [], []>} : vector<64x128xbf16>, vector<128x128xbf16>, vector<64x128xf32> -> vector<64x128xf32>
    %c0_4 = arith.constant 0 : index
    %c0_5 = arith.constant 0 : index
    %c0_6 = arith.constant 0 : index
    %5 = vector.load %arg3[%c0_4, %c0_5, %c0_6] : memref<3x1x128xf32, #tpu.memory_space<vmem>>, vector<1x1x128xf32>
    %6 = vector.shape_cast %5 : vector<1x1x128xf32> to vector<1x128xf32>
    %7 = vector.broadcast %6 : vector<1x128xf32> to vector<64x128xf32>
    %8 = arith.addf %4, %7 : vector<64x128xf32>
    %9 = arith.mulf %0, %8 : vector<64x128xf32>
    %10 = arith.addf %0, %9 : vector<64x128xf32>
    %11 = arith.truncf %10 : vector<64x128xf32> to vector<64x128xbf16>
    %c1 = arith.constant 1 : index
    %c0_7 = arith.constant 0 : index
    %c0_8 = arith.constant 0 : index
    %12 = vector.load %arg2[%c1, %c0_7, %c0_8] : memref<3x128x128xbf16, #tpu.memory_space<vmem>>, vector<1x128x128xbf16>
    %13 = vector.shape_cast %12 : vector<1x128x128xbf16> to vector<128x128xbf16>
    %cst_9 = arith.constant dense<0.000000e+00> : vector<64x128xf32>
    %14 = tpu.matmul %11, %13, %cst_9 {dimension_numbers = #tpu.dot_dimension_numbers<[1], [0], [0], [1], [0, 0, 1, 1], [], []>} : vector<64x128xbf16>, vector<128x128xbf16>, vector<64x128xf32> -> vector<64x128xf32>
    %c1_10 = arith.constant 1 : index
    %c0_11 = arith.constant 0 : index
    %c0_12 = arith.constant 0 : index
    %15 = vector.load %arg3[%c1_10, %c0_11, %c0_12] : memref<3x1x128xf32, #tpu.memory_space<vmem>>, vector<1x1x128xf32>
    %16 = vector.shape_cast %15 : vector<1x1x128xf32> to vector<1x128xf32>
    %17 = vector.broadcast %16 : vector<1x128xf32> to vector<64x128xf32>
    %18 = arith.addf %14, %17 : vector<64x128xf32>
    %19 = arith.mulf %0, %18 : vector<64x128xf32>
    %20 = arith.addf %10, %19 : vector<64x128xf32>
    %21 = arith.truncf %20 : vector<64x128xf32> to vector<64x128xbf16>
    %c2 = arith.constant 2 : index
    %c0_13 = arith.constant 0 : index
    %c0_14 = arith.constant 0 : index
    %22 = vector.load %arg2[%c2, %c0_13, %c0_14] : memref<3x128x128xbf16, #tpu.memory_space<vmem>>, vector<1x128x128xbf16>
    %23 = vector.shape_cast %22 : vector<1x128x128xbf16> to vector<128x128xbf16>
    %cst_15 = arith.constant dense<0.000000e+00> : vector<64x128xf32>
    %24 = tpu.matmul %21, %23, %cst_15 {dimension_numbers = #tpu.dot_dimension_numbers<[1], [0], [0], [1], [0, 0, 1, 1], [], []>} : vector<64x128xbf16>, vector<128x128xbf16>, vector<64x128xf32> -> vector<64x128xf32>
    %c2_16 = arith.constant 2 : index
    %c0_17 = arith.constant 0 : index
    %c0_18 = arith.constant 0 : index
    %25 = vector.load %arg3[%c2_16, %c0_17, %c0_18] : memref<3x1x128xf32, #tpu.memory_space<vmem>>, vector<1x1x128xf32>
    %26 = vector.shape_cast %25 : vector<1x1x128xf32> to vector<1x128xf32>
    %27 = vector.broadcast %26 : vector<1x128xf32> to vector<64x128xf32>
    %28 = arith.addf %24, %27 : vector<64x128xf32>
    %29 = arith.mulf %0, %28 : vector<64x128xf32>
    %30 = arith.addf %20, %29 : vector<64x128xf32>
    %c0_19 = arith.constant 0 : index
    %c0_20 = arith.constant 0 : index
    %31 = vector.load %arg4[%c0_19, %c0_20] : memref<64x128xf32, #tpu.memory_space<vmem>>, vector<64x128xf32>
    tpu.vector_store %arg4[%c0_19, %c0_20], %30 {strides = array<i32>} : memref<64x128xf32, #tpu.memory_space<vmem>>, vector<64x128xf32>,
    return
  }
  func.func @transform_0(%arg0: i32) -> (i32, i32) {
    %c0_i32 = arith.constant 0 : i32
    %c0_i32_0 = arith.constant 0 : i32
    return %arg0, %c0_i32 : i32, i32
  }
  func.func @transform_1(%arg0: i32) -> (i32, i32, i32) {
    %c0_i32 = arith.constant 0 : i32
    %c0_i32_0 = arith.constant 0 : i32
    %c0_i32_1 = arith.constant 0 : i32
    %c0_i32_2 = arith.constant 0 : i32
    return %c0_i32, %c0_i32_0, %c0_i32_1 : i32, i32, i32
  }
  func.func @transform_2(%arg0: i32) -> (i32, i32, i32) {
    %c0_i32 = arith.constant 0 : i32
    %c0_i32_0 = arith.constant 0 : i32
    %c0_i32_1 = arith.constant 0 : i32
    %c0_i32_2 = arith.constant 0 : i32
    return %c0_i32, %c0_i32_0, %c0_i32_1 : i32, i32, i32
  }
  func.func @transform_3(%arg0: i32) -> (i32, i32) {
    %c0_i32 = arith.constant 0 : i32
    %c0_i32_0 = arith.constant 0 : i32
    return %arg0, %c0_i32 : i32, i32
  }
}

</mosaic_0001>

<bundles_post_ra>
// kernel: tpu_custom_call.1
= control target key start
LH: loop header
LB: loop body
LE: loop exit
PB: predicated region body
PF: predicated region fallthrough
CT: control target
= control target key end

     0   :  { %8 = vsyncpa [#allocation3], 0  ;;  %s972_s0 = inlined_call_operand.hbm [shape: f32[64,128], index: 0, kind: input, shape index: {}]   ;;  %s973_s1 = inlined_call_operand.hbm [shape: bf16[3,128,128], index: 1, kind: input, shape index: {}]   ;;  %s974_s2 = inlined_call_operand.vmem [shape: f32[3,1,128], index: 2, kind: input, shape index: {}]   ;;  %s975_s3 = inlined_call_operand.hbm [shape: f32[64,128], index: 3, kind: output, shape index: {}]  }
   0x1   :  { %9 = vsyncpa [#allocation6], 0 }
   0x2   :  { %10 = vsyncpa [#allocation4], 0  ;;  %s806_s12 = smov [#allocation2]   ;;  %s734_s16 = scalar_lea.hbm %s972_s0, 1024 }
   0x3   :  { %s16_s13 = sshll.u32 %s806_s12, 4  ;;  %p735_p0 = scmp.ne.s32.totalorder %s972_s0, %s734_s16  ;;  %s17_s13 = int_to_ptr.vmem [resolvable:$true] %s16_s13 }
   0x4   :  { %p738_p1 = scmp.lt.u32.totalorder %s734_s16, %s972_s0 }
   0x6   :  { %p740_p2 = pnand %p738_p1, %p735_p0 }
   0x8   :  { %743 = shalt.err (!%p740_p2)
}
   0x9   :  { %s744_s21 = scalar_lea.vmem %s17_s13, 1024  ;;  %p749_p4 = scmp.lt.s32.totalorder %s17_s13, %s17_s13 }
   0xa   :  { %p745_p3 = scmp.ne.s32.totalorder %s17_s13, %s744_s21  ;;  %p750_p5 = scmp.lt.s32.totalorder %s744_s21, %s744_s21 }
   0xc   :  { %p751_p6 = por %p750_p5, %p749_p4 }
   0xe   :  { %p752_p7 = pnand %p751_p6, %p745_p3 }
  0x10   :  { %755 = shalt.err (!%p752_p7)
}
  0x11   :  { %s807_s22 = smov 128   ;;  %s808_s23 = smov 8  }
  0x12   :  { %22 = dma.hbm_to_vmem [thread:$0]  %s972_s0, 1024, %s17_s13, [#allocation3], %s807_s22, %s807_s22, %s808_s23  }
  0x13   :  { %s809_s26 = smov [#allocation5]   ;;  %s756_s30 = scalar_lea.hbm %s973_s1, 3072 }
  0x14   :  { %s28_s27 = sshll.u32 %s809_s26, 4  ;;  %p757_p8 = scmp.ne.s32.totalorder %s973_s1, %s756_s30  ;;  %s29_s27 = int_to_ptr.vmem [resolvable:$true] %s28_s27 }
  0x15   :  { %p760_p9 = scmp.lt.u32.totalorder %s756_s30, %s973_s1 }
  0x17   :  { %p762_p10 = pnand %p760_p9, %p757_p8 }
  0x19   :  { %765 = shalt.err (!%p762_p10)
}
  0x1a   :  { %s766_s8 = scalar_lea.vmem %s29_s27, 3072  ;;  %p771_p12 = scmp.lt.s32.totalorder %s29_s27, %s29_s27 }
  0x1b   :  { %p767_p11 = scmp.ne.s32.totalorder %s29_s27, %s766_s8  ;;  %p772_p13 = scmp.lt.s32.totalorder %s766_s8, %s766_s8 }
  0x1d   :  { %p773_p0 = por %p772_p13, %p771_p12 }
  0x1f   :  { %p774_p1 = pnand %p773_p0, %p767_p11 }
  0x21   :  { %777 = shalt.err (!%p774_p1)
}
  0x22   :  { %s810_s0 = smov 64   ;;  %s811_s9 = smov 4  }
  0x23   :  { %34 = dma.hbm_to_vmem [thread:$0]  %s973_s1, 3072, %s29_s27, [#allocation6], %s810_s0, %s810_s0, %s811_s9  }
  0x24   :  { %800 = dma.done.wait [#allocation3], 1024  }
  0x25   :  { %801 = vsyncadd [#allocation3], 4294966272 }
  0x26   :  { %802 = dma.done.wait [#allocation6], 3072  }
  0x27   :  { %803 = vsyncadd [#allocation6], 4294964224  ;;  %v710_v0 = vld [vmem:[#allocation5] sm:$0xff]   ;;  %v711_v1 = vld [vmem:[#allocation5 + $0x8] sm:$0xff]  }
  0x28   :  { %615 = vmatprep.subr.bf16.mxu0 %v710_v0  ;;  %v712_v2 = vld [vmem:[#allocation5 + $0x10] sm:$0xff]   ;;  %v713_v3 = vld [vmem:[#allocation5 + $0x18] sm:$0xff]   ;;  %v860_v4 = vld [vmem:[#allocation2] sm:$0xff] }
  0x29   :  { %616 = vmatpush3.bf16.msra.mxu0 %v710_v0  ;;  %v862_v5 = vld [vmem:[#allocation2 + $0x8] sm:$0xff]  ;;  %v714_v7 = vld [vmem:[#allocation5 + $0x20] sm:$0xff]   ;;  %v720_v11 = vld [vmem:[#allocation5 + $0x50] sm:$0xff]  }
  0x2a   :  { %617 = vmatprep.subr.bf16.mxu0 %v711_v1  ;;  %v52_v6 = vpack.c.bf16 %v862_v5, %v860_v4  ;;  %v718_v8 = vld [vmem:[#allocation5 + $0x40] sm:$0xff]   ;;  %v719_v9 = vld [vmem:[#allocation5 + $0x48] sm:$0xff]   ;;  %v721_v12 = vld [vmem:[#allocation5 + $0x58] sm:$0xff]  }
  0x2b   :  { %639 = vmatprep.subr.bf16.mxu1 %v718_v8  ;;  %v715_v10 = vld [vmem:[#allocation5 + $0x28] sm:$0xff]   ;;  %v716_v13 = vld [vmem:[#allocation5 + $0x30] sm:$0xff]   ;;  %v722_v14 = vld [vmem:[#allocation5 + $0x60] sm:$0xff]  }
  0x2c   :  { %631 = vmatprep.mubr.bf16.mxu0 %v52_v6  ;;  %640 = vmatpush3.bf16.msra.mxu1 %v718_v8  ;;  %v717_v15 = vld [vmem:[#allocation5 + $0x38] sm:$0xff]   ;;  %v866_v16 = vld [vmem:[#allocation2 + $0x10] sm:$0xff]  ;;  %v870_v18 = vld [vmem:[#allocation2 + $0x20] sm:$0xff] }
  0x2d   :  { %618 = vmatpush3.bf16.msra.mxu0 %v711_v1  ;;  %641 = vmatprep.subr.bf16.mxu1 %v719_v9  ;;  %v868_v17 = vld [vmem:[#allocation2 + $0x18] sm:$0xff]  ;;  %v872_v19 = vld [vmem:[#allocation2 + $0x28] sm:$0xff]  ;;  %v878_v22 = vld [vmem:[#allocation2 + $0x30] sm:$0xff] }
  0x2e   :  { %619 = vmatprep.subr.bf16.mxu0 %v712_v2  ;;  %v53_v20 = vpack.c.bf16 %v868_v17, %v866_v16  ;;  %v54_v21 = vpack.c.bf16 %v872_v19, %v870_v18  ;;  %v880_v23 = vld [vmem:[#allocation2 + $0x38] sm:$0xff]  ;;  %v723_v25 = vld [vmem:[#allocation5 + $0x68] sm:$0xff]   ;;  %v724_v26 = vld [vmem:[#allocation5 + $0x70] sm:$0xff]  }
  0x2f   :  { %v55_v24 = vpack.c.bf16 %v880_v23, %v878_v22  ;;  %v725_v27 = vld [vmem:[#allocation5 + $0x78] sm:$0xff]   ;;  %v726_v28 = vld [vmem:[#allocation5 + $0x80] sm:$0xff]   ;;  %v727_v29 = vld [vmem:[#allocation5 + $0x88] sm:$0xff]  }
  0x30   :  { %642 = vmatpush3.bf16.msra.mxu1 %v719_v9  ;;  %v728_v30 = vld [vmem:[#allocation5 + $0x90] sm:$0xff]   ;;  %v729_v31 = vld [vmem:[#allocation5 + $0x98] sm:$0xff]   ;;  %v730_v32 = vld [vmem:[#allocation5 + $0xa0] sm:$0xff]  }
  0x31   :  { %620 = vmatpush3.bf16.msra.mxu0 %v712_v2  ;;  %643 = vmatprep.subr.bf16.mxu1 %v720_v11  ;;  %v550_v33 = vld [vmem:[%s974_s2] ss:$0 sm:$0xff]  ;;  %v731_v8 = vld [vmem:[#allocation5 + $0xa8] sm:$0xff]   ;;  %v732_v9 = vld [vmem:[#allocation5 + $0xb0] sm:$0xff]  }
  0x32   :  { %621 = vmatprep.subr.bf16.mxu0 %v713_v3 }
  0x34   :  { %644 = vmatpush3.bf16.msra.mxu1 %v720_v11  ;;  %v560_v11 = vld [vmem:[%s974_s2 + $0x1] ss:$0 sm:$0xff] }
  0x35   :  { %622 = vmatpush3.bf16.msra.mxu0 %v713_v3  ;;  %645 = vmatprep.subr.bf16.mxu1 %v721_v12 }
  0x36   :  { %623 = vmatprep.subr.bf16.mxu0 %v714_v7 }
  0x38   :  { %646 = vmatpush3.bf16.msra.mxu1 %v721_v12 }
  0x39   :  { %624 = vmatpush3.bf16.msra.mxu0 %v714_v7  ;;  %647 = vmatprep.subr.bf16.mxu1 %v722_v14 }
  0x3a   :  { %625 = vmatprep.subr.bf16.mxu0 %v715_v10 }
  0x3c   :  { %648 = vmatpush3.bf16.msra.mxu1 %v722_v14 }
  0x3d   :  { %626 = vmatpush3.bf16.msra.mxu0 %v715_v10  ;;  %649 = vmatprep.subr.bf16.mxu1 %v723_v25  ;;  %v733_v10 = vld [vmem:[#allocation5 + $0xb8] sm:$0xff]  }
  0x3e   :  { %627 = vmatprep.subr.bf16.mxu0 %v716_v13 }
  0x40   :  { %650 = vmatpush3.bf16.msra.mxu1 %v723_v25 }
  0x41   :  { %628 = vmatpush3.bf16.msra.mxu0 %v716_v13  ;;  %651 = vmatprep.subr.bf16.mxu1 %v724_v26 }
  0x42   :  { %629 = vmatprep.subr.bf16.mxu0 %v717_v15 }
  0x44   :  { %652 = vmatpush3.bf16.msra.mxu1 %v724_v26 }
  0x45   :  { %630 = vmatpush3.bf16.msra.mxu0 %v717_v15  ;;  %653 = vmatprep.subr.bf16.mxu1 %v725_v27 }
  0x46   :  { %663 = vmatprep.subr.bf16.mxu0 %v726_v28 }
  0x48   :  { %632 = vmatmul.mubr.bf16.vlgmr.msra.gmra.mrb[0].mxu0 %v53_v20  ;;  %654 = vmatpush3.bf16.msra.mxu1 %v725_v27 }
  0x49   :  { %635 = vmatprep.mubr.bf16.mxu0 %v54_v21  ;;  %687 = vmatprep.subr.bf16.mxu1 %v726_v28 }
  0x4a   :  { %664 = vmatpush3.bf16.msra.mxu0 %v726_v28 }
  0x4b   :  { %665 = vmatprep.subr.bf16.mxu0 %v727_v29 }
  0x4e   :  { %666 = vmatpush3.bf16.msra.mxu0 %v727_v29 }
  0x4f   :  { %667 = vmatprep.subr.bf16.mxu0 %v728_v30 }
  0x50   :  { %636 = vmatmul.mubr.bf16.gmra.mrb[4].mxu0 %v55_v24 }
  0x52   :  { %668 = vmatpush3.bf16.msra.mxu0 %v728_v30 }
  0x53   :  { %669 = vmatprep.subr.bf16.mxu0 %v729_v31 }
  0x56   :  { %670 = vmatpush3.bf16.msra.mxu0 %v729_v31 }
  0x57   :  { %671 = vmatprep.subr.bf16.mxu0 %v730_v32 }
  0x5a   :  { %672 = vmatpush3.bf16.msra.mxu0 %v730_v32 }
  0x5b   :  { %673 = vmatprep.subr.bf16.mxu0 %v731_v8 }
  0x5e   :  { %674 = vmatpush3.bf16.msra.mxu0 %v731_v8 }
  0x5f   :  { %675 = vmatprep.subr.bf16.mxu0 %v732_v9 }
  0x62   :  { %676 = vmatpush3.bf16.msra.mxu0 %v732_v9 }
  0x63   :  { %677 = vmatprep.subr.bf16.mxu0 %v733_v10 }
  0x66   :  { %678 = vmatpush3.bf16.msra.mxu0 %v733_v10 }
 0x11b   :  { %v633_v34 = vpop.f32.mrb[0].mxu0 }
 0x11c   :  { %v170_v35 = vadd.f32 %v633_v34, %v550_v33  ;;  %v161_v36 = vpop.f32.mrb[1].mxu0 }
 0x11d   :  { %v162_v37 = vadd.f32 %v550_v33, %v161_v36  ;;  %v634_v38 = vpop.f32.mrb[2].mxu0 }
 0x11e   :  { %v173_v39 = vadd.f32 %v634_v38, %v550_v33  ;;  %v164_v40 = vpop.f32.mrb[3].mxu0  ;;  %v194_v43 = vmul.f32 %v170_v35, %v866_v16 }
 0x11f   :  { %v192_v41 = vmul.f32 %v162_v37, %v860_v4  ;;  %v165_v42 = vadd.f32 %v550_v33, %v164_v40 }
 0x120   :  { %v195_v44 = vmul.f32 %v173_v39, %v868_v17  ;;  %v901_v50 = vadd.f32 %v194_v43, %v866_v16 }
 0x121   :  { %v193_v45 = vmul.f32 %v165_v42, %v862_v5  ;;  %v895_v48 = vadd.f32 %v192_v41, %v860_v4 }
 0x122   :  { %v892_v46 = vadd.f32 %v195_v44, %v868_v17 }
 0x123   :  { %v637_v47 = vpop.f32.mrb[4].mxu0  ;;  %v898_v49 = vadd.f32 %v193_v45, %v862_v5 }
 0x124   :  { %v186_v51 = vadd.f32 %v637_v47, %v550_v33  ;;  %v177_v52 = vpop.f32.mrb[5].mxu0  ;;  %v209_v58 = vpack.c.bf16 %v892_v46, %v901_v50 }
 0x125   :  { %v178_v53 = vadd.f32 %v550_v33, %v177_v52  ;;  %v638_v54 = vpop.f32.mrb[6].mxu0  ;;  %v208_v55 = vpack.c.bf16 %v898_v49, %v895_v48 }
 0x126   :  { %v189_v56 = vadd.f32 %v638_v54, %v550_v33  ;;  %v180_v57 = vpop.f32.mrb[7].mxu0  ;;  %v198_v61 = vmul.f32 %v186_v51, %v878_v22  ;;  %v570_v54 = vld [vmem:[%s974_s2 + $0x2] ss:$0 sm:$0xff]  ;;  %s812_s2 = smov [#allocation7]  }
 0x127   :  { %v196_v59 = vmul.f32 %v178_v53, %v870_v18  ;;  %v181_v60 = vadd.f32 %v550_v33, %v180_v57  ;;  %655 = vmatprep.mubr.bf16.mxu1 %v208_v55  ;;  %s537_s17 = sshll.u32 %s812_s2, 4  ;;  %s538_s17 = int_to_ptr.vmem [resolvable:$true] %s537_s17 }
 0x128   :  { %v199_v62 = vmul.f32 %v189_v56, %v880_v23  ;;  %656 = vmatmul.mubr.bf16.vlgmr.msra.gmra.mrb[0].mxu1 %v209_v58  ;;  %v921_v3 = vadd.f32 %v198_v61, %v878_v22  ;;  %s778_s18 = scalar_lea.vmem %s538_s17, 1024  ;;  %p783_p3 = scmp.lt.s32.totalorder %s538_s17, %s538_s17 }
 0x129   :  { %v197_v63 = vmul.f32 %v181_v60, %v872_v19  ;;  %695 = vmatpush3.bf16.msra.mxu1 %v726_v28  ;;  %v915_v1 = vadd.f32 %v196_v59, %v870_v18  ;;  %p779_p2 = scmp.ne.s32.totalorder %s538_s17, %s778_s18  ;;  %p784_p4 = scmp.lt.s32.totalorder %s778_s18, %s778_s18 }
 0x12a   :  { %v912_v0 = vadd.f32 %v199_v62, %v880_v23  ;;  %688 = vmatprep.subr.bf16.mxu1 %v727_v29 }
 0x12b   :  { %v918_v2 = vadd.f32 %v197_v63, %v872_v19  ;;  %p785_p5 = por %p784_p4, %p783_p3 }
 0x12c   :  { %v211_v7 = vpack.c.bf16 %v912_v0, %v921_v3 }
 0x12d   :  { %v210_v6 = vpack.c.bf16 %v918_v2, %v915_v1  ;;  %696 = vmatpush3.bf16.msra.mxu1 %v727_v29  ;;  %p786_p6 = pnand %p785_p5, %p779_p2 }
 0x12e   :  { %689 = vmatprep.subr.bf16.mxu1 %v728_v30 }
 0x12f   :  { %659 = vmatprep.mubr.bf16.mxu1 %v210_v6 }
 0x130   :  { %660 = vmatmul.mubr.bf16.gmra.mrb[4].mxu1 %v211_v7 }
 0x131   :  { %697 = vmatpush3.bf16.msra.mxu1 %v728_v30 }
 0x132   :  { %690 = vmatprep.subr.bf16.mxu1 %v729_v31 }
 0x135   :  { %698 = vmatpush3.bf16.msra.mxu1 %v729_v31 }
 0x136   :  { %691 = vmatprep.subr.bf16.mxu1 %v730_v32 }
 0x139   :  { %699 = vmatpush3.bf16.msra.mxu1 %v730_v32 }
 0x13a   :  { %692 = vmatprep.subr.bf16.mxu1 %v731_v8 }
 0x13d   :  { %700 = vmatpush3.bf16.msra.mxu1 %v731_v8 }
 0x13e   :  { %693 = vmatprep.subr.bf16.mxu1 %v732_v9 }
 0x141   :  { %701 = vmatpush3.bf16.msra.mxu1 %v732_v9 }
 0x142   :  { %694 = vmatprep.subr.bf16.mxu1 %v733_v10 }
 0x145   :  { %702 = vmatpush3.bf16.msra.mxu1 %v733_v10 }
 0x1fb   :  { %v657_v12 = vpop.f32.mrb[0].mxu1 }
 0x1fc   :  { %v328_v13 = vadd.f32 %v657_v12, %v560_v11  ;;  %v319_v14 = vpop.f32.mrb[1].mxu1 }
 0x1fd   :  { %v320_v15 = vadd.f32 %v560_v11, %v319_v14  ;;  %v658_v20 = vpop.f32.mrb[2].mxu1 }
 0x1fe   :  { %v331_v21 = vadd.f32 %v658_v20, %v560_v11  ;;  %v322_v24 = vpop.f32.mrb[3].mxu1  ;;  %v352_v27 = vmul.f32 %v328_v13, %v866_v16 }
 0x1ff   :  { %v350_v25 = vmul.f32 %v320_v15, %v860_v4  ;;  %v323_v26 = vadd.f32 %v560_v11, %v322_v24 }
 0x200   :  { %v353_v28 = vmul.f32 %v331_v21, %v868_v17  ;;  %v360_v34 = vadd.f32 %v352_v27, %v901_v50 }
 0x201   :  { %v351_v29 = vmul.f32 %v323_v26, %v862_v5  ;;  %v358_v31 = vadd.f32 %v350_v25, %v895_v48 }
 0x202   :  { %v361_v30 = vadd.f32 %v353_v28, %v892_v46 }
 0x203   :  { %v359_v32 = vadd.f32 %v351_v29, %v898_v49  ;;  %v661_v33 = vpop.f32.mrb[4].mxu1 }
 0x204   :  { %v344_v35 = vadd.f32 %v661_v33, %v560_v11  ;;  %v335_v36 = vpop.f32.mrb[5].mxu1  ;;  %v367_v40 = vpack.c.bf16 %v361_v30, %v360_v34 }
 0x205   :  { %v336_v37 = vadd.f32 %v560_v11, %v335_v36  ;;  %v662_v38 = vpop.f32.mrb[6].mxu1  ;;  %v366_v39 = vpack.c.bf16 %v359_v32, %v358_v31 }
 0x206   :  { %v347_v41 = vadd.f32 %v662_v38, %v560_v11  ;;  %v338_v42 = vpop.f32.mrb[7].mxu1  ;;  %v356_v45 = vmul.f32 %v344_v35, %v878_v22 }
 0x207   :  { %v354_v43 = vmul.f32 %v336_v37, %v870_v18  ;;  %v339_v44 = vadd.f32 %v560_v11, %v338_v42  ;;  %679 = vmatprep.mubr.bf16.mxu0 %v366_v39 }
 0x208   :  { %v357_v46 = vmul.f32 %v347_v41, %v880_v23  ;;  %680 = vmatmul.mubr.bf16.vlgmr.msra.gmra.mrb[8].mxu0 %v367_v40  ;;  %v364_v51 = vadd.f32 %v356_v45, %v921_v3 }
 0x209   :  { %v355_v47 = vmul.f32 %v339_v44, %v872_v19  ;;  %v362_v49 = vadd.f32 %v354_v43, %v915_v1 }
 0x20a   :  { %v365_v48 = vadd.f32 %v357_v46, %v912_v0 }
 0x20b   :  { %v363_v50 = vadd.f32 %v355_v47, %v918_v2 }
 0x20c   :  { %v369_v53 = vpack.c.bf16 %v365_v48, %v364_v51 }
 0x20d   :  { %v368_v52 = vpack.c.bf16 %v363_v50, %v362_v49 }
 0x20f   :  { %683 = vmatprep.mubr.bf16.mxu1 %v368_v52 }
 0x210   :  { %684 = vmatmul.mubr.bf16.vlgmr.msra.gmra.mrb[8].mxu1 %v369_v53 }
 0x2db   :  { %v681_v55 = vpop.f32.mrb[8].mxu0 }
 0x2dc   :  { %v486_v56 = vadd.f32 %v681_v55, %v570_v54  ;;  %v477_v57 = vpop.f32.mrb[9].mxu0 }
 0x2dd   :  { %v478_v58 = vadd.f32 %v570_v54, %v477_v57  ;;  %v682_v59 = vpop.f32.mrb[10].mxu0 }
 0x2de   :  { %v510_v60 = vmul.f32 %v486_v56, %v866_v16  ;;  %v489_v61 = vadd.f32 %v682_v59, %v570_v54  ;;  %v480_v62 = vpop.f32.mrb[11].mxu0 }
 0x2df   :  { %v508_v63 = vmul.f32 %v478_v58, %v860_v4  ;;  %v481_v0 = vadd.f32 %v570_v54, %v480_v62 }
 0x2e0   :  { %v518_v1 = vadd.f32 %v510_v60, %v360_v34  ;;  %v511_v2 = vmul.f32 %v489_v61, %v868_v17 }
 0x2e1   :  { %v516_v3 = vadd.f32 %v508_v63, %v358_v31  ;;  %v509_v6 = vmul.f32 %v481_v0, %v862_v5 }
 0x2e2   :  { %526 = vst [vmem:[#allocation7 + $0x10] sm:$0xff] %v518_v1  ;;  %v519_v7 = vadd.f32 %v511_v2, %v361_v30 }
 0x2e3   :  { %524 = vst [vmem:[#allocation7] sm:$0xff] %v516_v3  ;;  %v517_v8 = vadd.f32 %v509_v6, %v359_v32  ;;  %v685_v9 = vpop.f32.mrb[8].mxu1 }
 0x2e4   :  { %527 = vst [vmem:[#allocation7 + $0x18] sm:$0xff] %v519_v7  ;;  %v502_v10 = vadd.f32 %v685_v9, %v570_v54  ;;  %v493_v11 = vpop.f32.mrb[9].mxu1 }
 0x2e5   :  { %525 = vst [vmem:[#allocation7 + $0x8] sm:$0xff] %v517_v8  ;;  %v494_v16 = vadd.f32 %v570_v54, %v493_v11  ;;  %v686_v12 = vpop.f32.mrb[10].mxu1 }
 0x2e6   :  { %v514_v4 = vmul.f32 %v502_v10, %v878_v22  ;;  %v505_v13 = vadd.f32 %v686_v12, %v570_v54  ;;  %v496_v14 = vpop.f32.mrb[11].mxu1 }
 0x2e7   :  { %v512_v17 = vmul.f32 %v494_v16, %v870_v18  ;;  %v497_v15 = vadd.f32 %v570_v54, %v496_v14 }
 0x2e8   :  { %v522_v20 = vadd.f32 %v514_v4, %v364_v51  ;;  %v515_v5 = vmul.f32 %v505_v13, %v880_v23 }
 0x2e9   :  { %v520_v21 = vadd.f32 %v512_v17, %v362_v49  ;;  %v513_v24 = vmul.f32 %v497_v15, %v872_v19 }
 0x2ea   :  { %530 = vst [vmem:[#allocation7 + $0x30] sm:$0xff] %v522_v20  ;;  %v523_v25 = vadd.f32 %v515_v5, %v365_v48 }
 0x2eb   :  { %528 = vst [vmem:[#allocation7 + $0x20] sm:$0xff] %v520_v21  ;;  %v521_v26 = vadd.f32 %v513_v24, %v363_v50 }
 0x2ec   :  { %531 = vst [vmem:[#allocation7 + $0x38] sm:$0xff] %v523_v25 }
 0x2ed   :  { %529 = vst [vmem:[#allocation7 + $0x28] sm:$0xff] %v521_v26 }
 0x2ee   :  { %789 = shalt.err (!%p786_p6)
}
 0x2ef   :  { %s790_s21 = scalar_lea.hbm %s975_s3, 1024 }
 0x2f0   :  { %p791_p7 = scmp.ne.s32.totalorder %s975_s3, %s790_s21  ;;  %p794_p8 = scmp.lt.u32.totalorder %s790_s21, %s975_s3 }
 0x2f2   :  { %p796_p9 = pnand %p794_p8, %p791_p7 }
 0x2f4   :  { %799 = shalt.err (!%p796_p9)
}
 0x2f5   :  { %543 = dma.vmem_to_hbm [thread:$0]  %s538_s17, 1024, %s975_s3, [#allocation4], %s807_s22, %s807_s22, %s808_s23  }
 0x2f6   :  { %804 = dma.done.wait [#allocation4], 1024  }
 0x2f7   :  { %805 = vsyncadd [#allocation4], 4294966272 }
 0x2f8   :  { %547 = vsyncpa [#allocation3], 1 }
 0x2f9   :  { %548 = vsyncpa [#allocation6], 1 }
 0x2fa   :  { %549 = vsyncpa [#allocation4], 1 }

</bundles_post_ra>
